<compile_context>
chip_gen: v6e
topology: v6e:2x2x1
jax: 0.10.0
libtpu: 0.0.40
codegen_flags: <defaults>
</compile_context>

<pallas_src>
import math

import jax
import jax.numpy as jnp
from jax.experimental import pallas as pl
from jax.experimental.pallas import tpu as pltpu


def _round_up(x, m):
    return ((x + m - 1) // m) * m


def _gemm_bias_kernel(x_ref, w_ref, b_ref, o_ref):
    # x_ref : (tm, Kp) bf16    w_ref : (Kp, tn) bf16 (VMEM-resident column)
    # b_ref : (1,  tn) f32     o_ref : (tm, tn)
    acc = jnp.dot(x_ref[...], w_ref[...], preferred_element_type=jnp.float32)
    o_ref[...] = (acc + b_ref[...]).astype(o_ref.dtype)


def patch_embed_overlap(x, weight, bias, *, patch_size, stride_size,
                        compute_dtype=jnp.bfloat16, out_dtype=None):
    """x: (B, C, H, W) NCHW.  weight: (E, C, ph, pw).  bias: (E,).

    Returns (B, num_patches, E) == conv(x).flatten(2).transpose(1, 2).
    Matmul runs in `compute_dtype` (bf16) with f32 accumulation + f32 bias.
    """
    B, C, H, W = x.shape
    ph, pw = patch_size
    sh, sw = stride_size
    num_y = (H - ph) // sh + 1
    num_x = (W - pw) // sw + 1
    P = num_y * num_x
    E = weight.shape[0]
    K = C * ph * pw
    M = B * P
    if out_dtype is None:
        out_dtype = x.dtype

    # --- glue: overlapping-window extraction as ONE XLA op, in bf16, with the
    # feature (K) dim emitted LAST so no transpose is needed afterwards.
    # Feature ordering inside K is (C, ph, pw), matching weight.reshape(E, K).
    x_c = x.astype(compute_dtype)
    patches = jax.lax.conv_general_dilated_patches(
        x_c, filter_shape=(ph, pw), window_strides=(sh, sw), padding="VALID",
        dimension_numbers=("NCHW", "OIHW", "NHWC"))     # -> (B, ny, nx, K)
    xp = patches.reshape(M, K)                          # free view, no transpose

    w2d = weight.astype(compute_dtype).reshape(E, K).T  # (K, E) bf16
    b2d = bias.reshape(1, E).astype(jnp.float32)        # bias stays f32

    # --- tiling ------------------------------------------------------------
    Kp = _round_up(K, 128)

    # Full-K, VMEM-resident weight column; use the whole E extent per step when
    # it comfortably fits VMEM (true for all standard ViT embed dims).
    Ep0 = _round_up(E, 128)
    if Kp * Ep0 * 2 <= 8 * 1024 * 1024:
        tn = Ep0
    else:
        tn = 512
    Ep = _round_up(E, tn)

    # bf16-packed M tile (multiple of 16), large to amortize per-step overhead.
    tm = min(512, _round_up(M, 16))
    # v7x has 2 TensorCores: make sure the parallel M axis has >= 2 grid points
    # whenever M allows it (harmless extra step on single-TC v5e/v6e).
    if _round_up(M, tm) // tm < 2 and tm > 16:
        tm = max(16, _round_up(-(-M // 2), 16))
    Mp = _round_up(M, tm)

    if (Mp, Kp) != (M, K):
        xp = jnp.pad(xp, ((0, Mp - M), (0, Kp - K)))
    if (Kp, Ep) != (K, E):
        w2d = jnp.pad(w2d, ((0, Kp - K), (0, Ep - E)))
    if Ep != E:
        b2d = jnp.pad(b2d, ((0, 0), (0, Ep - E)))

    grid = (Mp // tm, Ep // tn)

    # VMEM budget (double-buffered inputs/outputs) -- cap below v7x's 64 MiB.
    out_itemsize = jnp.dtype(out_dtype).itemsize
    est = (2 * tm * Kp * 2          # x tiles (bf16)
           + 2 * Kp * tn * 2        # weight column (bf16)
           + 2 * tn * 4             # bias
           + 2 * tm * tn * out_itemsize)
    vmem_limit = int(min(48 * 1024 * 1024, max(8 * 1024 * 1024, 2 * est)))

    out2d = pl.pallas_call(
        _gemm_bias_kernel,
        out_shape=jax.ShapeDtypeStruct((Mp, Ep), out_dtype),
        grid_spec=pltpu.PrefetchScalarGridSpec(
            num_scalar_prefetch=0,
            grid=grid,
            in_specs=[
                # NOTE: if profiling shows exposed x-tile DMA on v6e, add
                # pipeline_mode=pl.Buffered(3) to this spec.
                pl.BlockSpec((tm, Kp), lambda i, j: (i, 0)),
                pl.BlockSpec((Kp, tn), lambda i, j: (0, j)),  # resident along M
                pl.BlockSpec((1, tn), lambda i, j: (0, j)),
            ],
            out_specs=pl.BlockSpec((tm, tn), lambda i, j: (i, j)),
        ),
        compiler_params=pltpu.CompilerParams(
            dimension_semantics=("parallel", "parallel"),
            vmem_limit_bytes=vmem_limit,
        ),
    )(xp, w2d, b2d)

    # Slice only if padding was actually added (avoids an extra HBM copy when
    # M and E are already tile-aligned, e.g. ViT-base embed_dim=768).
    if Mp != M or Ep != E:
        out2d = out2d[:M, :E]
    return out2d.reshape(B, P, E)


if __name__ == "__main__":
    # Small, consistent configuration:
    #   img_size=16, patch_size=8, stride_size=4, in_chans=4, embed_dim=32
    #   -> num_y = num_x = (16-8)//4 + 1 = 3, num_patches = 9
    B, C, Hh, Ww = 2, 4, 16, 16
    patch = (8, 8)
    stride = (4, 4)
    embed_dim = 32

    key = jax.random.PRNGKey(0)
    kx, kw, kb = jax.random.split(key, 3)

    x = jax.random.normal(kx, (B, C, Hh, Ww), dtype=jnp.float32)

    # Conv2d weight init from the module: normal(0, sqrt(2 / (kh*kw*out_channels)))
    n = patch[0] * patch[1] * embed_dim
    weight = jax.random.normal(kw, (embed_dim, C, patch[0], patch[1]),
                               dtype=jnp.float32) * math.sqrt(2.0 / n)
    # Conv2d bias: default PyTorch init is uniform(-1/sqrt(fan_in), 1/sqrt(fan_in))
    fan_in = C * patch[0] * patch[1]
    bound = 1.0 / math.sqrt(fan_in)
    bias = jax.random.uniform(kb, (embed_dim,), dtype=jnp.float32,
                              minval=-bound, maxval=bound)

    out = patch_embed_overlap(x, weight, bias,
                              patch_size=patch, stride_size=stride)
    out = jax.block_until_ready(out)

    # Reference: conv with bf16-rounded inputs (kernel computes in bf16 on the
    # MXU with f32 accumulation), f32 math, same flatten/transpose semantics.
    xr = x.astype(jnp.bfloat16).astype(jnp.float32)
    wr = weight.astype(jnp.bfloat16).astype(jnp.float32)
    ref = jax.lax.conv_general_dilated(
        xr, wr, window_strides=stride, padding="VALID",
        dimension_numbers=("NCHW", "OIHW", "NCHW"),
    ) + bias[None, :, None, None]
    ref = ref.reshape(B, embed_dim, -1).transpose(0, 2, 1)

    assert out.shape == (B, 9, embed_dim), out.shape
    assert jnp.allclose(out.astype(jnp.float32), ref, atol=2e-2, rtol=2e-2)

    print("KERNEL_OK")
</pallas_src>

<mosaic_0001>
module attributes {stable_mosaic.version = 11 : i64} {
  func.func @_gemm_bias_kernel(%arg0: i32, %arg1: i32, %arg2: memref<16x256xbf16, #tpu.memory_space<vmem>>, %arg3: memref<256x128xbf16, #tpu.memory_space<vmem>>, %arg4: memref<1x128xf32, #tpu.memory_space<vmem>>, %arg5: memref<16x128xf32, #tpu.memory_space<vmem>>) attributes {dimension_semantics = [#tpu.dimension_semantics<parallel>, #tpu.dimension_semantics<parallel>], iteration_bounds = array<i64: 2, 1>, scalar_prefetch = 0 : i64, scratch_operands = 0 : i64, tpu.core_type = #tpu.core_type<tc>, window_params = [{transform_indices = @transform_0, window_bounds = array<i64: 16, 256>}, {transform_indices = @transform_1, window_bounds = array<i64: 256, 128>}, {transform_indices = @transform_2, window_bounds = array<i64: 1, 128>}, {transform_indices = @transform_3, window_bounds = array<i64: 16, 128>}]} {
    %c0 = arith.constant 0 : index
    %c0_0 = arith.constant 0 : index
    %0 = vector.load %arg2[%c0, %c0_0] : memref<16x256xbf16, #tpu.memory_space<vmem>>, vector<16x256xbf16>
    %c0_1 = arith.constant 0 : index
    %c0_2 = arith.constant 0 : index
    %1 = vector.load %arg3[%c0_1, %c0_2] : memref<256x128xbf16, #tpu.memory_space<vmem>>, vector<256x128xbf16>
    %cst = arith.constant dense<0.000000e+00> : vector<16x128xf32>
    %2 = tpu.matmul %0, %1, %cst {dimension_numbers = #tpu.dot_dimension_numbers<[1], [0], [0], [1], [0, 0, 1, 1], [], []>} : vector<16x256xbf16>, vector<256x128xbf16>, vector<16x128xf32> -> vector<16x128xf32>
    %c0_3 = arith.constant 0 : index
    %c0_4 = arith.constant 0 : index
    %3 = vector.load %arg4[%c0_3, %c0_4] : memref<1x128xf32, #tpu.memory_space<vmem>>, vector<1x128xf32>
    %4 = vector.broadcast %3 : vector<1x128xf32> to vector<16x128xf32>
    %5 = arith.addf %2, %4 : vector<16x128xf32>
    %c0_5 = arith.constant 0 : index
    %c0_6 = arith.constant 0 : index
    %6 = vector.load %arg5[%c0_5, %c0_6] : memref<16x128xf32, #tpu.memory_space<vmem>>, vector<16x128xf32>
    tpu.vector_store %arg5[%c0_5, %c0_6], %5 {strides = array<i32>} : memref<16x128xf32, #tpu.memory_space<vmem>>, vector<16x128xf32>,
    return
  }
  func.func @transform_0(%arg0: i32, %arg1: i32) -> (i32, i32) {
    %c0_i32 = arith.constant 0 : i32
    %c0_i32_0 = arith.constant 0 : i32
    return %arg0, %c0_i32 : i32, i32
  }
  func.func @transform_1(%arg0: i32, %arg1: i32) -> (i32, i32) {
    %c0_i32 = arith.constant 0 : i32
    %c0_i32_0 = arith.constant 0 : i32
    return %c0_i32, %arg1 : i32, i32
  }
  func.func @transform_2(%arg0: i32, %arg1: i32) -> (i32, i32) {
    %c0_i32 = arith.constant 0 : i32
    %c0_i32_0 = arith.constant 0 : i32
    return %c0_i32, %arg1 : i32, i32
  }
  func.func @transform_3(%arg0: i32, %arg1: i32) -> (i32, i32) {
    %c0_i32 = arith.constant 0 : i32
    return %arg0, %arg1 : i32, i32
  }
}

</mosaic_0001>

<bundles_post_ra>
// kernel: tpu_custom_call.1
= control target key start
LH: loop header
LB: loop body
LE: loop exit
PB: predicated region body
PF: predicated region fallthrough
CT: control target
= control target key end

     0   :  { %8 = vsyncpa [#allocation3], 0  ;;  %s1077_s0 = inlined_call_operand.hbm [shape: bf16[32,256], index: 0, kind: input, shape index: {}]   ;;  %s1078_s1 = inlined_call_operand.hbm [shape: bf16[256,128], index: 1, kind: input, shape index: {}]   ;;  %s1079_s2 = inlined_call_operand.vmem [shape: f32[1,128], index: 2, kind: input, shape index: {}]   ;;  %s1080_s3 = inlined_call_operand.hbm [shape: f32[32,128], index: 3, kind: output, shape index: {}]  }
   0x1   :  { %10 = vsyncpa [#allocation3 + $0x1], 0 }
   0x2   :  { %11 = vsyncpa [#allocation6], 0 }
   0x3   :  { %12 = vsyncpa [#allocation4], 0 }
   0x4   :  { %14 = vsyncpa [#allocation4 + $0x1], 0  ;;  %s885_s12 = smov 0   ;;  %s887_s13 = smov 0  }
   0x5   :  { %s889_s14 = smov 0   ;;  %s891_s15 = smov 0  }
   0x6   :  { %s893_s16 = smov 0   ;;  %s895_s17 = smov 0  }
   0x7 LB: > { %s555_s18 = sadd.s32 4294967295, %s854_s17   ;;  %s556_s19 = sadd.s32 4294967294, %s854_s17   ;;  %s854_s17 = sphi %s895_s17, %s20_s17   ;;  %s850_s16 = sphi %s893_s16, %s1098_s16   ;;  %s846_s15 = sphi %s891_s15, %s1097_s15   ;;  %s842_s14 = sphi %s889_s14, %s1096_s14   ;;  %s838_s13 = sphi %s887_s13, %s1095_s13   ;;  %s834_s12 = sphi %s885_s12, %s1094_s12  }
   0x8   : > { %p52_p0 = scmp.ne.s32.totalorder %s838_s13, %s834_s12  ;;  %p919_p1 = scmp.eq.s32.totalorder %s555_s18, 0 }
   0x9   : > { %p923_p2 = scmp.eq.s32.totalorder %s555_s18, 1  ;;  %p136_p3 = scmp.eq.s32.totalorder %s556_s19, 1 }
   0xa   : > { %p929_p4 = por %p919_p1, %p52_p0  ;;  %p557_p5 = scmp.ge.s32.totalorder %s854_s17, 1 }
   0xb   : > { %p934_p6 = por %p136_p3, %p52_p0  ;;  %p143_p7 = scmp.lt.s32.totalorder %s854_s17, 3 }
   0xc   : > { %s1084_s22 = scalar_select %p929_p4, 1, 0 }
   0xd   : > { %s1085_s23 = scalar_select %p934_p6, 1, 0 }
   0xe   : > { %p939_p8 = pnand %p557_p5, %p143_p7  ;;  %s856_s25 = smov [#allocation5]  }
   0xf   : > { %s157_s26 = sshll.u32 %s856_s25, 4  ;;  %s32_s28 = sadd.s32 1, %s850_s16  ;;  %s158_s26 = int_to_ptr.vmem [resolvable:$true] %s157_s26 }
  0x10   : > { %p626_p9 = pneg %p939_p8  ;;  %s727_s29 = scalar_lea.vmem %s158_s26, 2048 }
  0x11   : > { %p728_p13 = scmp.ne.s32.totalorder %s158_s26, %s727_s29  ;;  %p735_p5 = scmp.lt.s32.totalorder %s158_s26, %s158_s26 }
  0x12   : > { %p948_p11 = pnand %p626_p9, %p919_p1  ;;  %p736_p7 = scmp.lt.s32.totalorder %s727_s29, %s727_s29 }
  0x14   : > { %p718_p12 = pneg %p948_p11  ;;  %p737_p6 = por %p736_p7, %p735_p5 }
  0x16   : > { %p730_p0 = pnand %p728_p13, %p718_p12 }
  0x18   : > { %p731_p3 = pneg %p730_p0 }
  0x1a   : > { %p738_p4 = pnand %p737_p6, %p731_p3 }
  0x1c   : > { %741 = shalt.err (!%p738_p4)
}
  0x1d   : > { %s857_s30 = smov 64   ;;  %s858_s4 = smov 4  }
  0x1e   : > { %629 = dma.hbm_to_vmem [thread:$0]  (!%p948_p11), %s1078_s1, 2048, %s158_s26, [#allocation6], %s857_s30, %s857_s30, %s858_s4  }
  0x1f   : > { %p34_p6 = scmp.ge.s32.totalorder %s32_s28, 2  ;;  %s39_s7 = sadd.s32 1, %s842_s14 }
  0x20   : > { %p46_p4 = scmp.ne.s32.totalorder %s842_s14, %s838_s13  ;;  %p47_p9 = scmp.eq.s32.totalorder %s854_s17, 0 }
  0x21   : > { %s1100_s28 = smov (%p34_p6, %s32_s28), 0  ;;  %p639_p0 = scmp.lt.s32.totalorder %s854_s17, 2 }
  0x22   : > { %p966_p12 = por %p47_p9, %p46_p4  ;;  %p972_p13 = por %p923_p2, %p46_p4 }
  0x23   : > { %s36_s10 = ssub.s32 %s850_s16, %s1100_s28  ;;  %s177_s11 = sand.u32 1, %s842_s14  }
  0x24   : > { %p37_p11 = scmp.eq.s32.totalorder %s36_s10, 0  ;;  %s561_s18 = sshll.u32 %s177_s11, 4 }
  0x25   : > { %s594_s25 = sshll.u32 %s850_s16, 8  ;;  %s181_s30 = scalar_lea.vmem [#allocation2], %s561_s18 }
  0x26   : > { %s981_s19 = scalar_select %p37_p11, %s842_s14, %s39_s7  }
  0x27   : > { %s188_s29 = scalar_lea.hbm %s1077_s0, %s594_s25  ;;  %s189_s4 = sshll.u32 %s181_s30, 4  ;;  %s190_s4 = int_to_ptr.vmem [resolvable:$true] %s189_s4 }
  0x28   : > { %p989_p2 = pnand %p639_p0, %p966_p12  ;;  %s178_s5 = scalar_lea.sflag [#allocation3], %s177_s11 }
  0x29   : > { %s755_s6 = scalar_lea.vmem %s190_s4, 256  ;;  %s859_s7 = smov [#allocation2]  }
  0x2a   : > { %p744_p3 = pneg %p989_p2  ;;  %p756_p5 = scmp.ne.s32.totalorder %s190_s4, %s755_s6 }
  0x2b   : > { %s760_s10 = sshll.u32 %s859_s7, 4  ;;  %s761_s10 = int_to_ptr.vmem [resolvable:$false] %s760_s10 }
  0x2c   : > { %p758_p7 = pnand %p756_p5, %p744_p3  ;;  %s762_s25 = scalar_lea.vmem %s761_s10, 512 }
  0x2d   : > { %p763_p4 = scmp.lt.s32.totalorder %s190_s4, %s761_s10  ;;  %p764_p9 = scmp.lt.s32.totalorder %s762_s25, %s755_s6 }
  0x2e   : > { %p759_p6 = pneg %p758_p7 }
  0x2f   : > { %p765_p11 = por %p764_p9, %p763_p4 }
  0x31   : > { %p766_p10 = pnand %p765_p11, %p759_p6 }
  0x33   : > { %769 = shalt.err (!%p766_p10)
}
  0x34   : > { %s860_s8 = smov 128   ;;  %s861_s18 = smov 8  }
  0x35   : > { %633 = dma.hbm_to_vmem [thread:$0]  (!%p989_p2), %s188_s29, 256, %s190_s4, %s178_s5, %s860_s8, %s860_s8, %s861_s18  }
  0x36   : > { %201 = sbr.rel (%p939_p8) target bundleno = 312 (0x138), region = 32  ;;  %s1000_s11 = sand.u32 (!%p939_p8), 1, %s838_s13  }
  0x37   : > { %s566_s26 = sshll.u32 (!%p939_p8), %s1000_s11, 4  ;;  %s204_s27 = scalar_lea.sflag (!%p939_p8), [#allocation3], %s1000_s11 }
  0x38   : > { %s1006_s30 = scalar_lea.vmem (!%p939_p8), [#allocation2], %s566_s26  ;;  %p1091_p10 = scmp.ne.s32.totalorder (!%p939_p8), %s1084_s22, 0 }
  0x3b   : > { %821 = dma.done.wait (%p1091_p10), %s204_s27, 256  }
  0x3c   : > { %823 = vsyncadd (%p1091_p10), %s204_s27, 4294967040 }
  0x3d   : > { %825 = dma.done.wait (%p919_p1), [#allocation6], 2048  }
  0x3e   : > { %827 = vsyncadd (%p919_p1), [#allocation6], 4294965248  ;;  %v697_v0 = vld [vmem:[#allocation5 + $0x78] sm:$0xff]   ;;  %v699_v2 = vld [vmem:[#allocation5 + $0x70] sm:$0xff]   ;;  %s236_s24 = scalar_lea.vmem [#allocation7], %s566_s26  ;;  %s595_s4 = sshll.u32 %s846_s15, 8 }
  0x3f   : > { %v698_v1 = vld [vmem:[#allocation5 + $0x38] sm:$0xff]   ;;  %596 = vmatprep.subr.bf16.mxu0 %v697_v0  ;;  %v700_v3 = vld [vmem:[#allocation5 + $0x30] sm:$0xff]   ;;  %v701_v4 = vld [vmem:[#allocation5 + $0x68] sm:$0xff]   ;;  %s448_s29 = sshll.u32 %s236_s24, 4  ;;  %s1029_s6 = scalar_lea.hbm %s1080_s3, %s595_s4  ;;  %s1024_s29 = int_to_ptr.vmem [resolvable:$true] %s448_s29 }
  0x40   : > { %597 = vmatpush3.bf16.msra.mxu0 %v698_v1  ;;  %v702_v5 = vld [vmem:[#allocation5 + $0x28] sm:$0xff]   ;;  %v703_v6 = vld [vmem:[#allocation5 + $0x60] sm:$0xff]   ;;  %v705_v8 = vld [vmem:[#allocation5 + $0x58] sm:$0xff]   ;;  %s434_s7 = scalar_lea.sflag [#allocation4], %s1000_s11  ;;  %s770_s10 = scalar_lea.vmem %s1024_s29, 256 }
  0x41   : > { %598 = vmatprep.subr.bf16.mxu0 %v699_v2  ;;  %v704_v7 = vld [vmem:[#allocation5 + $0x20] sm:$0xff]   ;;  %v706_v9 = vld [vmem:[#allocation5 + $0x18] sm:$0xff]   ;;  %v707_v10 = vld [vmem:[#allocation5 + $0x50] sm:$0xff]   ;;  %p771_p1 = scmp.ne.s32.totalorder %s1024_s29, %s770_s10  ;;  %s862_s15 = smov [#allocation7]  }
  0x42   : > { %v715_v11 = vld [vmem:[%s1006_s30 + $0x4] ss:$8 sps:$4 sm:$0xff]   ;;  %v713_v17 = vld [vmem:[%s1006_s30] ss:$8 sps:$4 sm:$0xff]   ;;  %s774_s25 = sshll.u32 %s862_s15, 4  ;;  %s775_s25 = int_to_ptr.vmem [resolvable:$false] %s774_s25 }
  0x43   : > { %v708_v12 = vld [vmem:[#allocation5 + $0x10] sm:$0xff]   ;;  %422 = vmatprep.mubr.bf16.mxu0 %v715_v11  ;;  %v709_v13 = vld [vmem:[#allocation5 + $0x48] sm:$0xff]   ;;  %v711_v15 = vld [vmem:[#allocation5 + $0x40] sm:$0xff]   ;;  %p772_p8 = pnand %p771_p1, %p972_p13  ;;  %s776_s8 = scalar_lea.vmem %s775_s25, 512 }
  0x44   : > { %599 = vmatpush3.bf16.msra.mxu0 %v700_v3  ;;  %v710_v14 = vld [vmem:[#allocation5 + $0x8] sm:$0xff]   ;;  %v712_v16 = vld [vmem:[#allocation5] sm:$0xff]   ;;  %p777_p0 = scmp.lt.s32.totalorder %s1024_s29, %s775_s25  ;;  %p778_p2 = scmp.lt.s32.totalorder %s776_s8, %s770_s10 }
  0x45   : > { %600 = vmatprep.subr.bf16.mxu0 %v701_v4  ;;  %v569_v19 = vld [vmem:[%s1079_s2] ss:$0 sm:$0xff]  ;;  %p773_p12 = pneg %p772_p8 }
  0x46   : > { %p779_p3 = por %p778_p2, %p777_p0 }
  0x48   : > { %601 = vmatpush3.bf16.msra.mxu0 %v702_v5  ;;  %p780_p5 = pnand %p779_p3, %p773_p12 }
  0x49   : > { %602 = vmatprep.subr.bf16.mxu0 %v703_v6 }
  0x4c   : > { %603 = vmatpush3.bf16.msra.mxu0 %v704_v7 }
  0x4d   : > { %604 = vmatprep.subr.bf16.mxu0 %v705_v8 }
  0x50   : > { %605 = vmatpush3.bf16.msra.mxu0 %v706_v9 }
  0x51   : > { %606 = vmatprep.subr.bf16.mxu0 %v707_v10 }
  0x54   : > { %607 = vmatpush3.bf16.msra.mxu0 %v708_v12 }
  0x55   : > { %608 = vmatprep.subr.bf16.mxu0 %v709_v13 }
  0x58   : > { %609 = vmatpush3.bf16.msra.mxu0 %v710_v14 }
  0x59   : > { %610 = vmatprep.subr.bf16.mxu0 %v711_v15 }
  0x5c   : > { %611 = vmatpush3.bf16.msra.mxu0 %v712_v16 }
  0x5f   : > { %423 = vmatmul.mubr.bf16.vlgmr.msra.gmra.mxu0 %v713_v17 }
 0x11f   : > { %v612_v18 = vpop.f32.mrf.mxu0 }
 0x121   : > { %v613_v20 = vpop.f32.mrf.mxu0 }
 0x122   : > { %v614_v21 = vadd.f32 %v613_v20, %v612_v18 }
 0x123   : > { %v615_v22 = vpop.f32.mrf.mxu0 }
 0x124   : > { %v425_v23 = vadd.f32 %v614_v21, %v569_v19 }
 0x125   : > { %v616_v24 = vpop.f32.mrf.mxu0 }
 0x126   : > { %431 = vst [vmem:[%s236_s24] sm:$0xff] %v425_v23  ;;  %v617_v25 = vadd.f32 %v616_v24, %v615_v22 }
 0x128   : > { %v428_v26 = vadd.f32 %v617_v25, %v569_v19 }
 0x12a   : > { %432 = vst [vmem:[%s236_s24 + $0x8] sm:$0xff] %v428_v26 }
 0x12b   : > { %783 = shalt.err (!%p780_p5)
}
 0x12c   : > { %s784_s18 = scalar_lea.hbm %s1029_s6, 256  ;;  %s788_s30 = scalar_lea.hbm %s1080_s3, 512 }
 0x12d   : > { %p785_p7 = scmp.ne.s32.totalorder %s1029_s6, %s784_s18  ;;  %p789_p9 = scmp.lt.s32.totalorder %s1029_s6, %s1080_s3 }
 0x12e   : > { %p790_p11 = scmp.lt.s32.totalorder %s788_s30, %s784_s18 }
 0x12f   : > { %p786_p6 = pnand %p785_p7, %p972_p13 }
 0x130   : > { %p791_p10 = por %p790_p11, %p789_p9 }
 0x131   : > { %p787_p4 = pneg %p786_p6 }
 0x133   : > { %p792_p1 = pnand %p791_p10, %p787_p4 }
 0x135   : > { %795 = shalt.err (!%p792_p1)
}
 0x136   : > { %s863_s24 = smov 128   ;;  %s864_s4 = smov 8  }
 0x137   : > { %624 = dma.vmem_to_hbm [thread:$0]  (%p972_p13), %s1024_s29, 256, %s1029_s6, %s434_s7, %s863_s24, %s863_s24, %s864_s4  }
 0x138 PF: > { %s463_s21 = sand.u32 1, %s834_s12   ;;  %p1092_p8 = scmp.ne.s32.totalorder %s1085_s23, 0 }
 0x139   : > { %p1093_p12 = scmp.ge.s32.totalorder %s854_s17, 2  ;;  %s464_s5 = scalar_lea.sflag [#allocation4], %s463_s21 }
 0x13b   : > { %p635_p0 = pnand %p1093_p12, %p1092_p8 }
 0x13d   : > { %p636_p2 = pneg %p635_p0 }
 0x13f   : > { %829 = dma.done.wait (%p636_p2), %s464_s5, 256  }
 0x140   : > { %831 = vsyncadd (%p636_p2), %s464_s5, 4294967040  ;;  %s20_s17 = sadd.s32 1, %s854_s17   ;;  %s1094_s12 = smov %s838_s13 }
 0x141   : > { %p17_p3 = scmp.ge.s32.totalorder %s20_s17, 4   ;;  %s1095_s13 = smov %s842_s14 }
 0x142   : > { %s1096_s14 = smov %s981_s19  ;;  %s1097_s15 = smov %s850_s16 }
 0x143   : > { %s1098_s16 = smov %s1100_s28  ;;  %19 = sbr.rel (!%p17_p3) target bundleno = 7 (0x7), region = 85 }
 0x148   :  { %469 = vsyncpa [#allocation3], 1 }
 0x149   :  { %471 = vsyncpa [#allocation3 + $0x1], 1 }
 0x14a   :  { %472 = vsyncpa [#allocation6], 1 }
 0x14b   :  { %473 = vsyncpa [#allocation4], 1 }
 0x14c   :  { %475 = vsyncpa [#allocation4 + $0x1], 1 }

</bundles_post_ra>
